<compile_context>
chip_gen: v5e
topology: v5e:2x2
jax: 0.10.0
libtpu: 0.0.40
codegen_flags: <defaults>
</compile_context>

<pallas_src>
import numpy as np
import jax
import jax.numpy as jnp
from jax import lax
from jax.experimental import pallas as pl
from jax.experimental.pallas import tpu as pltpu


# ----------------------------------------------------------------------------
# Host-side helpers (static metadata; "init-time" work, not per-forward HBM ops)
# ----------------------------------------------------------------------------
def _vmem_budget():
    """(in-flight block budget, scoped-vmem limit) sized per TPU generation."""
    try:
        cap = pltpu.get_tpu_info().vmem_capacity_bytes
    except Exception:
        cap = 64 * 1024 * 1024                     # be conservative (v7x: 64 MiB/TC)
    if cap <= 64 * 1024 * 1024:                    # v7x
        return 12 * 1024 * 1024, 40 * 1024 * 1024
    return 32 * 1024 * 1024, 64 * 1024 * 1024      # v5e / v6e (128 MiB physical)


def _pick_class_block(n_cls, per_class_bytes, budget, *, min_blocks=4):
    """Largest class batch that (a) fits the VMEM budget, (b) leaves >= min_blocks
    grid steps (input/output DMA pipelining; v7x's 2 TCs split the parallel axis),
    (c) prefers an exact divisor of n_cls (no ragged last block) and an even
    number of blocks (balanced v7x TensorCore split)."""
    c = max(1, min(n_cls, int(budget // max(per_class_bytes, 1))))
    if n_cls >= min_blocks:
        c = min(c, -(-n_cls // min_blocks))
    divs = [d for d in range(1, c + 1) if n_cls % d == 0]
    best = divs[-1]
    for d in reversed(divs):
        if 2 * d >= best and (n_cls // d) % 2 == 0:
            best = d
            break
    return best if 4 * best >= c else c            # else: ragged last block


def _window_scatter_tables(position, n_ctx, nl_max, name_lens):
    """Inverse-permutation (scatter) tables for the moving window.

    The window covers absolute prompt rows [1, 1 + n_ctx + nl_max); window row r
    is absolute row 1 + r.  Sources are the ctx rows and the suffix rows < nl_max.
      inv_ctx[i, j] = window row receiving ctx[j]           (n_cls, n_ctx)
      inv_suf[i, j] = window row receiving suffix[:, j]     (n_cls, nl_max)
    Rows >= 1 + n_ctx + nl_max are identical to the "end" layout for every class
    (suffix tail), so they are excluded from the gather entirely.
    """
    n_cls = len(name_lens)
    half = n_ctx // 2
    inv_ctx = np.zeros((n_cls, n_ctx), np.int32)
    inv_suf = np.zeros((n_cls, nl_max), np.int32)
    for i, nl in enumerate(int(x) for x in name_lens):
        tail = (n_ctx + np.arange(nl, nl_max)).astype(np.int32)   # identity region
        if position == "middle":
            inv_ctx[i, :half] = np.arange(half, dtype=np.int32)
            inv_ctx[i, half:] = (half + nl + np.arange(n_ctx - half)).astype(np.int32)
            inv_suf[i, :nl] = (half + np.arange(nl)).astype(np.int32)
            inv_suf[i, nl:nl_max] = tail
        elif position == "front":
            inv_ctx[i, :] = (nl + np.arange(n_ctx)).astype(np.int32)
            inv_suf[i, :nl] = np.arange(nl, dtype=np.int32)
            inv_suf[i, nl:nl_max] = tail
        else:
            raise ValueError(position)
    return inv_ctx, inv_suf


# ----------------------------------------------------------------------------
# "end": pure concat -> DMA-only kernel (no vreg copies, no masked stores)
# ----------------------------------------------------------------------------
def _forward_end(ctx, prefix, suffix, generic, n_cls, n_ctx, n_suf, S, dim,
                 out_dtype, itemsize, budget, vmem_limit, class_block):
    # VMEM is only used for the (C, n_ctx, D) ctx slab in the generic case; the
    # class block otherwise just bounds per-step DMA granularity.
    per_class = itemsize * dim * (S + n_ctx)
    C = class_block if class_block is not None else _pick_class_block(
        n_cls, per_class, budget)
    C = int(max(1, min(C, n_cls)))
    n_blocks = -(-n_cls // C)

    hbm = pl.BlockSpec(memory_space=pl.ANY)

    if generic:
        def kernel(ctx_ref, pre_hbm, suf_hbm, out_hbm, slab_ref, sem_ref):
            i = pl.program_id(0)
            # Clamp the (possibly ragged) last block: overlapping classes are
            # simply re-written with identical bytes.
            base = jnp.minimum(i * C, n_cls - C)
            # Replicate the shared ctx across the class batch in VMEM only (the
            # 2-D ctx is read from HBM once by the pipelined BlockSpec; it is
            # never materialized as (n_cls, n_ctx, D) in HBM).
            slab_ref[...] = jnp.broadcast_to(
                ctx_ref[...][None, :, :], (C, n_ctx, dim)).astype(out_dtype)
            cp_pre = pltpu.make_async_copy(
                pre_hbm.at[pl.ds(base, C)],
                out_hbm.at[pl.ds(base, C), pl.ds(0, 1)], sem_ref.at[0])
            cp_ctx = pltpu.make_async_copy(
                slab_ref,
                out_hbm.at[pl.ds(base, C), pl.ds(1, n_ctx)], sem_ref.at[1])
            cp_suf = pltpu.make_async_copy(
                suf_hbm.at[pl.ds(base, C)],
                out_hbm.at[pl.ds(base, C), pl.ds(1 + n_ctx, n_suf)], sem_ref.at[2])
            cp_pre.start(); cp_ctx.start(); cp_suf.start()
            cp_pre.wait(); cp_ctx.wait(); cp_suf.wait()

        in_specs = [pl.BlockSpec((n_ctx, dim), lambda i: (0, 0)),  # ctx -> VMEM
                    hbm, hbm]
        scratch = [pltpu.VMEM((C, n_ctx, dim), out_dtype),
                   pltpu.SemaphoreType.DMA((3,))]
    else:
        def kernel(ctx_hbm, pre_hbm, suf_hbm, out_hbm, sem_ref):
            i = pl.program_id(0)
            base = jnp.minimum(i * C, n_cls - C)
            cp_pre = pltpu.make_async_copy(
                pre_hbm.at[pl.ds(base, C)],
                out_hbm.at[pl.ds(base, C), pl.ds(0, 1)], sem_ref.at[0])
            cp_ctx = pltpu.make_async_copy(
                ctx_hbm.at[pl.ds(base, C)],
                out_hbm.at[pl.ds(base, C), pl.ds(1, n_ctx)], sem_ref.at[1])
            cp_suf = pltpu.make_async_copy(
                suf_hbm.at[pl.ds(base, C)],
                out_hbm.at[pl.ds(base, C), pl.ds(1 + n_ctx, n_suf)], sem_ref.at[2])
            cp_pre.start(); cp_ctx.start(); cp_suf.start()
            cp_pre.wait(); cp_ctx.wait(); cp_suf.wait()

        in_specs = [hbm, hbm, hbm]
        scratch = [pltpu.SemaphoreType.DMA((3,))]

    return pl.pallas_call(
        kernel,
        out_shape=jax.ShapeDtypeStruct((n_cls, S, dim), out_dtype),
        grid_spec=pltpu.PrefetchScalarGridSpec(
            num_scalar_prefetch=0,
            grid=(n_blocks,),
            in_specs=in_specs,
            out_specs=pl.BlockSpec(memory_space=pl.ANY),
            scratch_shapes=scratch),
        compiler_params=pltpu.CompilerParams(
            dimension_semantics=("parallel",),
            vmem_limit_bytes=vmem_limit),
    )(ctx, prefix, suffix)


# ----------------------------------------------------------------------------
# "middle" / "front": windowed one-hot gather + identity suffix tail
# ----------------------------------------------------------------------------
def _forward_gather(ctx, prefix, suffix, name_lens, position, generic,
                    n_cls, n_ctx, n_suf, S, dim, out_dtype, itemsize,
                    budget, vmem_limit, class_block):
    nl_max = int(name_lens.max())
    Wg = n_ctx + nl_max                     # rows [1, 1+Wg) move; the rest is identity

    inv_ctx, inv_suf = _window_scatter_tables(position, n_ctx, nl_max, name_lens)
    inv_ctx = jnp.asarray(inv_ctx.reshape(n_cls, 1, n_ctx))
    inv_suf = jnp.asarray(inv_suf.reshape(n_cls, 1, nl_max))

    # Per-class VMEM footprint: double-buffered I/O blocks plus the in-kernel f32
    # window accumulator, one-hot masks and the (broadcast / CSC) ctx operand.
    per_class = (2 * itemsize * dim * (1 + n_suf + S)
                 + 2 * itemsize * dim * n_ctx
                 + 4 * Wg * dim
                 + itemsize * Wg * dim
                 + 4 * Wg * (n_ctx + nl_max)
                 + 8 * (n_ctx + nl_max))
    C = class_block if class_block is not None else _pick_class_block(
        n_cls, per_class, budget)
    C = int(max(1, min(C, n_cls)))
    n_blocks = -(-n_cls // C)
    # If C does not divide n_cls the final partial block is handled by Pallas
    # (out-of-range rows of the last block are not written back).

    if generic:
        # Shared 2-D ctx: full-array BlockSpec with a constant index_map; it stays
        # VMEM-resident and is never materialized as (n_cls, n_ctx, D) in HBM.
        ctx_spec = pl.BlockSpec((n_ctx, dim), lambda i: (0, 0))
    else:
        ctx_spec = pl.BlockSpec((C, n_ctx, dim), lambda i: (i, 0, 0))

    def kernel(ictx_ref, isuf_ref, pre_ref, ctx_ref, suf_ref, out_ref):
        out_ref[:, 0:1, :] = pre_ref[...]                   # prefix row never moves
        # One-hot scatter masks for the moving window (VPU compares; no lane slices).
        rows_c = lax.broadcasted_iota(jnp.int32, (C, Wg, n_ctx), 1)
        rows_s = lax.broadcasted_iota(jnp.int32, (C, Wg, nl_max), 1)
        oh_ctx = (rows_c == ictx_ref[...]).astype(out_dtype)      # (C, Wg, n_ctx)
        oh_suf = (rows_s == isuf_ref[...]).astype(out_dtype)      # (C, Wg, nl_max)
        if generic:
            # Replicated in vregs/VMEM only (HBM reads ctx exactly once).
            ctx_b = jnp.broadcast_to(ctx_ref[...][None, :, :], (C, n_ctx, dim))
        else:
            ctx_b = ctx_ref[...]
        win = jnp.einsum("cts,csd->ctd", oh_ctx, ctx_b.astype(out_dtype),
                         preferred_element_type=jnp.float32,
                         precision=lax.Precision.HIGHEST)
        win = win + jnp.einsum("cts,csd->ctd", oh_suf, suf_ref[:, :nl_max, :],
                               preferred_element_type=jnp.float32,
                               precision=lax.Precision.HIGHEST)
        out_ref[:, 1:1 + Wg, :] = win.astype(out_dtype)
        if nl_max < n_suf:                                   # identity suffix tail
            out_ref[:, 1 + Wg:, :] = suf_ref[:, nl_max:, :]

    in_specs = [pl.BlockSpec((C, 1, n_ctx), lambda i: (i, 0, 0)),
                pl.BlockSpec((C, 1, nl_max), lambda i: (i, 0, 0)),
                pl.BlockSpec((C, 1, dim), lambda i: (i, 0, 0)),
                ctx_spec,
                pl.BlockSpec((C, n_suf, dim), lambda i: (i, 0, 0))]
    out_spec = pl.BlockSpec((C, S, dim), lambda i: (i, 0, 0))

    return pl.pallas_call(
        kernel,
        out_shape=jax.ShapeDtypeStruct((n_cls, S, dim), out_dtype),
        grid_spec=pltpu.PrefetchScalarGridSpec(
            num_scalar_prefetch=0,
            grid=(n_blocks,),
            in_specs=in_specs,
            out_specs=out_spec),
        compiler_params=pltpu.CompilerParams(
            dimension_semantics=("parallel",),
            vmem_limit_bytes=vmem_limit),
    )(inv_ctx, inv_suf, prefix, ctx, suffix)


# ----------------------------------------------------------------------------
# Public wrapper (mirrors PromptLearner.forward)
# ----------------------------------------------------------------------------
def prompt_learner_forward(ctx, token_prefix, token_suffix, name_lens,
                           class_token_position, *, class_block=None):
    """ctx: (n_ctx, D) generic or (n_cls, n_ctx, D) class-specific (CSC).
    token_prefix: (n_cls, 1, D), token_suffix: (n_cls, n_suf, D).
    Returns prompts: (n_cls, 1 + n_ctx + n_suf, D)."""
    n_cls, _, dim = token_prefix.shape
    n_suf = token_suffix.shape[1]
    generic = (ctx.ndim == 2)
    n_ctx = ctx.shape[-2]
    S = 1 + n_ctx + n_suf
    out_dtype = token_prefix.dtype
    itemsize = jnp.dtype(out_dtype).itemsize
    budget, vmem_limit = _vmem_budget()

    name_lens = np.asarray(name_lens, dtype=np.int64).reshape(-1)
    if name_lens.shape[0] != n_cls:
        raise ValueError("name_lens must have one entry per class")
    if np.any(name_lens < 1) or np.any(name_lens > n_suf):
        raise ValueError("name_lens must lie in [1, n_suf]")

    if ctx.dtype != out_dtype:                 # keep DMA / matmul operands uniform
        ctx = ctx.astype(out_dtype)

    if class_token_position == "end":
        return _forward_end(ctx, token_prefix, token_suffix, generic,
                            n_cls, n_ctx, n_suf, S, dim, out_dtype, itemsize,
                            budget, vmem_limit, class_block)
    if class_token_position in ("middle", "front"):
        return _forward_gather(ctx, token_prefix, token_suffix, name_lens,
                               class_token_position, generic,
                               n_cls, n_ctx, n_suf, S, dim, out_dtype, itemsize,
                               budget, vmem_limit, class_block)
    raise ValueError(class_token_position)


# ----------------------------------------------------------------------------
# Pure-numpy reference mirroring the PyTorch forward exactly.
# ----------------------------------------------------------------------------
def reference_forward(ctx, prefix, suffix, name_lens, position):
    n_cls = prefix.shape[0]
    if ctx.ndim == 2:
        ctx = np.broadcast_to(ctx[None], (n_cls,) + ctx.shape)
    n_ctx = ctx.shape[1]
    if position == "end":
        return np.concatenate([prefix, ctx, suffix], axis=1)
    half = n_ctx // 2
    prompts = []
    for i in range(n_cls):
        nl = int(name_lens[i])
        pre_i, cls_i, suf_i = prefix[i:i+1], suffix[i:i+1, :nl], suffix[i:i+1, nl:]
        if position == "middle":
            p = np.concatenate([pre_i, ctx[i:i+1, :half], cls_i,
                                ctx[i:i+1, half:], suf_i], axis=1)
        elif position == "front":
            p = np.concatenate([pre_i, cls_i, ctx[i:i+1], suf_i], axis=1)
        else:
            raise ValueError(position)
        prompts.append(p)
    return np.concatenate(prompts, axis=0)


if __name__ == "__main__":
    # Small deterministic synthetic setup consistent with the module.
    n_cls, n_ctx, ctx_dim, seq_len = 6, 4, 128, 16
    n_suf = seq_len - 1 - n_ctx
    name_lens = [3, 1, 4, 2, 5, 2]                 # each < n_suf (EOS/pad room)

    key = jax.random.PRNGKey(0)
    k_ctx, k_emb, k_csc = jax.random.split(key, 3)
    # nn.init.normal_(ctx_vectors, std=0.02)
    ctx_generic = (0.02 * jax.random.normal(k_ctx, (n_ctx, ctx_dim))).astype(jnp.float32)
    ctx_csc = (0.02 * jax.random.normal(k_csc, (n_cls, n_ctx, ctx_dim))).astype(jnp.float32)
    # Synthetic clip_model.token_embedding(tokenized_prompts)
    embedding = jax.random.normal(k_emb, (n_cls, seq_len, ctx_dim)).astype(jnp.float32)
    token_prefix = embedding[:, :1, :]             # SOS embedding
    token_suffix = embedding[:, 1 + n_ctx:, :]     # class tokens + EOS + padding

    def check(ctx_arr, position, **kw):
        out = prompt_learner_forward(ctx_arr, token_prefix, token_suffix,
                                     name_lens, position, **kw)
        out = jax.block_until_ready(out)
        ref = reference_forward(np.asarray(ctx_arr), np.asarray(token_prefix),
                                np.asarray(token_suffix), name_lens, position)
        np.testing.assert_allclose(np.asarray(out), ref, rtol=0, atol=1e-5)

    # Generic ctx: default (heuristic) class batching for all three positions.
    for position in ("end", "middle", "front"):
        check(ctx_generic, position)
    # Multi-block (divisor) class batching.
    for position in ("end", "middle", "front"):
        check(ctx_generic, position, class_block=3)
    # Ragged last block on the DMA "end" path (explicit clamped overlap).
    check(ctx_generic, "end", class_block=4)
    check(ctx_csc, "end", class_block=4)
    # Class-specific contexts (CSC).
    check(ctx_csc, "end")
    check(ctx_csc, "middle", class_block=3)
    check(ctx_csc, "front", class_block=2)

    # TODO(synk): CLIP tokenizer / token_embedding are string ops with no Pallas
    # equivalent; their outputs are synthesized deterministically above.
    print("KERNEL_OK")
</pallas_src>

<mosaic_0001>
module attributes {stable_mosaic.version = 11 : i64} {
  func.func @kernel(%arg0: i32, %arg1: memref<4x128xf32, #tpu.memory_space<vmem>>, %arg2: memref<6x1x128xf32, #tpu.memory_space<any>>, %arg3: memref<6x11x128xf32, #tpu.memory_space<any>>, %arg4: memref<6x16x128xf32, #tpu.memory_space<any>>, %arg5: memref<1x4x128xf32, #tpu.memory_space<vmem>>, %arg6: memref<3x!tpu.dma_semaphore, #tpu.memory_space<semaphore_mem>>) attributes {dimension_semantics = [#tpu.dimension_semantics<parallel>], iteration_bounds = array<i64: 6>, scalar_prefetch = 0 : i64, scratch_operands = 2 : i64, tpu.core_type = #tpu.core_type<tc>, window_params = [{pipeline_mode = #tpu.pipeline_mode<synchronous>, transform_indices = @transform_0, window_bounds = array<i64: 4, 128>}, {}, {}, {}]} {
    %c1_i32 = arith.constant 1 : i32
    %0 = arith.muli %arg0, %c1_i32 : i32
    %c5_i32 = arith.constant 5 : i32
    %1 = arith.minsi %0, %c5_i32 : i32
    %c0 = arith.constant 0 : index
    %c0_0 = arith.constant 0 : index
    %2 = vector.load %arg1[%c0, %c0_0] : memref<4x128xf32, #tpu.memory_space<vmem>>, vector<4x128xf32>
    %3 = vector.shape_cast %2 : vector<4x128xf32> to vector<1x4x128xf32>
    %c0_1 = arith.constant 0 : index
    %c0_2 = arith.constant 0 : index
    %c0_3 = arith.constant 0 : index
    %4 = vector.load %arg5[%c0_1, %c0_2, %c0_3] : memref<1x4x128xf32, #tpu.memory_space<vmem>>, vector<1x4x128xf32>
    tpu.vector_store %arg5[%c0_1, %c0_2, %c0_3], %3 {strides = array<i32>} : memref<1x4x128xf32, #tpu.memory_space<vmem>>, vector<1x4x128xf32>,
    %c0_i32 = arith.constant 0 : i32
    %c0_i32_4 = arith.constant 0 : i32
    %c0_i32_5 = arith.constant 0 : i32
    %5 = tpu.memref_slice %arg2[%1, %c0_i32_4, %c0_i32_5] : memref<6x1x128xf32, #tpu.memory_space<any>> -> memref<1x1x128xf32, #tpu.memory_space<any>>
    %c0_i32_6 = arith.constant 0 : i32
    %c0_i32_7 = arith.constant 0 : i32
    %6 = tpu.memref_slice %arg4[%1, %c0_i32_6, %c0_i32_7] : memref<6x16x128xf32, #tpu.memory_space<any>> -> memref<1x1x128xf32, #tpu.memory_space<any>>
    %7 = tpu.memref_slice %arg6[%c0_i32] : memref<3x!tpu.dma_semaphore, #tpu.memory_space<semaphore_mem>> -> memref<1x!tpu.dma_semaphore, #tpu.memory_space<semaphore_mem>>
    %8 = tpu.memref_squeeze %7 : memref<1x!tpu.dma_semaphore, #tpu.memory_space<semaphore_mem>> -> memref<!tpu.dma_semaphore, #tpu.memory_space<semaphore_mem>>
    tpu.enqueue_dma source(%5 : memref<1x1x128xf32, #tpu.memory_space<any>>) target(%6 : memref<1x1x128xf32, #tpu.memory_space<any>>) target_semaphore(%8 : memref<!tpu.dma_semaphore, #tpu.memory_space<semaphore_mem>>)
    %c1_i32_8 = arith.constant 1 : i32
    %c1_i32_9 = arith.constant 1 : i32
    %c0_i32_10 = arith.constant 0 : i32
    %9 = tpu.memref_slice %arg4[%1, %c1_i32_9, %c0_i32_10] : memref<6x16x128xf32, #tpu.memory_space<any>> -> memref<1x4x128xf32, #tpu.memory_space<any>>
    %10 = tpu.memref_slice %arg6[%c1_i32_8] : memref<3x!tpu.dma_semaphore, #tpu.memory_space<semaphore_mem>> -> memref<1x!tpu.dma_semaphore, #tpu.memory_space<semaphore_mem>>
    %11 = tpu.memref_squeeze %10 : memref<1x!tpu.dma_semaphore, #tpu.memory_space<semaphore_mem>> -> memref<!tpu.dma_semaphore, #tpu.memory_space<semaphore_mem>>
    tpu.enqueue_dma source(%arg5 : memref<1x4x128xf32, #tpu.memory_space<vmem>>) target(%9 : memref<1x4x128xf32, #tpu.memory_space<any>>) target_semaphore(%11 : memref<!tpu.dma_semaphore, #tpu.memory_space<semaphore_mem>>)
    %c2_i32 = arith.constant 2 : i32
    %c0_i32_11 = arith.constant 0 : i32
    %c0_i32_12 = arith.constant 0 : i32
    %12 = tpu.memref_slice %arg3[%1, %c0_i32_11, %c0_i32_12] : memref<6x11x128xf32, #tpu.memory_space<any>> -> memref<1x11x128xf32, #tpu.memory_space<any>>
    %c5_i32_13 = arith.constant 5 : i32
    %c0_i32_14 = arith.constant 0 : i32
    %13 = tpu.memref_slice %arg4[%1, %c5_i32_13, %c0_i32_14] : memref<6x16x128xf32, #tpu.memory_space<any>> -> memref<1x11x128xf32, #tpu.memory_space<any>>
    %14 = tpu.memref_slice %arg6[%c2_i32] : memref<3x!tpu.dma_semaphore, #tpu.memory_space<semaphore_mem>> -> memref<1x!tpu.dma_semaphore, #tpu.memory_space<semaphore_mem>>
    %15 = tpu.memref_squeeze %14 : memref<1x!tpu.dma_semaphore, #tpu.memory_space<semaphore_mem>> -> memref<!tpu.dma_semaphore, #tpu.memory_space<semaphore_mem>>
    tpu.enqueue_dma source(%12 : memref<1x11x128xf32, #tpu.memory_space<any>>) target(%13 : memref<1x11x128xf32, #tpu.memory_space<any>>) target_semaphore(%15 : memref<!tpu.dma_semaphore, #tpu.memory_space<semaphore_mem>>)
    %c0_i32_15 = arith.constant 0 : i32
    %c0_i32_16 = arith.constant 0 : i32
    %c0_i32_17 = arith.constant 0 : i32
    %16 = tpu.memref_slice %arg2[%1, %c0_i32_16, %c0_i32_17] : memref<6x1x128xf32, #tpu.memory_space<any>> -> memref<1x1x128xf32, #tpu.memory_space<any>>
    %c0_i32_18 = arith.constant 0 : i32
    %c0_i32_19 = arith.constant 0 : i32
    %17 = tpu.memref_slice %arg4[%1, %c0_i32_18, %c0_i32_19] : memref<6x16x128xf32, #tpu.memory_space<any>> -> memref<1x1x128xf32, #tpu.memory_space<any>>
    %18 = tpu.memref_slice %arg6[%c0_i32_15] : memref<3x!tpu.dma_semaphore, #tpu.memory_space<semaphore_mem>> -> memref<1x!tpu.dma_semaphore, #tpu.memory_space<semaphore_mem>>
    %19 = tpu.memref_squeeze %18 : memref<1x!tpu.dma_semaphore, #tpu.memory_space<semaphore_mem>> -> memref<!tpu.dma_semaphore, #tpu.memory_space<semaphore_mem>>
    tpu.wait_dma2 semaphore(%19 : memref<!tpu.dma_semaphore, #tpu.memory_space<semaphore_mem>>) src(%16 : memref<1x1x128xf32, #tpu.memory_space<any>>) dst(%17 : memref<1x1x128xf32, #tpu.memory_space<any>>)
    %c1_i32_20 = arith.constant 1 : i32
    %c1_i32_21 = arith.constant 1 : i32
    %c0_i32_22 = arith.constant 0 : i32
    %20 = tpu.memref_slice %arg4[%1, %c1_i32_21, %c0_i32_22] : memref<6x16x128xf32, #tpu.memory_space<any>> -> memref<1x4x128xf32, #tpu.memory_space<any>>
    %21 = tpu.memref_slice %arg6[%c1_i32_20] : memref<3x!tpu.dma_semaphore, #tpu.memory_space<semaphore_mem>> -> memref<1x!tpu.dma_semaphore, #tpu.memory_space<semaphore_mem>>
    %22 = tpu.memref_squeeze %21 : memref<1x!tpu.dma_semaphore, #tpu.memory_space<semaphore_mem>> -> memref<!tpu.dma_semaphore, #tpu.memory_space<semaphore_mem>>
    tpu.wait_dma2 semaphore(%22 : memref<!tpu.dma_semaphore, #tpu.memory_space<semaphore_mem>>) src(%arg5 : memref<1x4x128xf32, #tpu.memory_space<vmem>>) dst(%20 : memref<1x4x128xf32, #tpu.memory_space<any>>)
    %c2_i32_23 = arith.constant 2 : i32
    %c0_i32_24 = arith.constant 0 : i32
    %c0_i32_25 = arith.constant 0 : i32
    %23 = tpu.memref_slice %arg3[%1, %c0_i32_24, %c0_i32_25] : memref<6x11x128xf32, #tpu.memory_space<any>> -> memref<1x11x128xf32, #tpu.memory_space<any>>
    %c5_i32_26 = arith.constant 5 : i32
    %c0_i32_27 = arith.constant 0 : i32
    %24 = tpu.memref_slice %arg4[%1, %c5_i32_26, %c0_i32_27] : memref<6x16x128xf32, #tpu.memory_space<any>> -> memref<1x11x128xf32, #tpu.memory_space<any>>
    %25 = tpu.memref_slice %arg6[%c2_i32_23] : memref<3x!tpu.dma_semaphore, #tpu.memory_space<semaphore_mem>> -> memref<1x!tpu.dma_semaphore, #tpu.memory_space<semaphore_mem>>
    %26 = tpu.memref_squeeze %25 : memref<1x!tpu.dma_semaphore, #tpu.memory_space<semaphore_mem>> -> memref<!tpu.dma_semaphore, #tpu.memory_space<semaphore_mem>>
    tpu.wait_dma2 semaphore(%26 : memref<!tpu.dma_semaphore, #tpu.memory_space<semaphore_mem>>) src(%23 : memref<1x11x128xf32, #tpu.memory_space<any>>) dst(%24 : memref<1x11x128xf32, #tpu.memory_space<any>>)
    return
  }
  func.func @transform_0(%arg0: i32) -> (i32, i32) {
    %c0_i32 = arith.constant 0 : i32
    %c0_i32_0 = arith.constant 0 : i32
    %c0_i32_1 = arith.constant 0 : i32
    return %c0_i32, %c0_i32_0 : i32, i32
  }
}

</mosaic_0001>

<bundles_post_ra>
// kernel: tpu_custom_call.1
= control target key start
LH: loop header
LB: loop body
LE: loop exit
PB: predicated region body
PF: predicated region fallthrough
CT: control target
= control target key end

     0   :  { %s277_s12 = smov 0   ;;  %s346_s0 = inlined_call_operand.vmem [shape: f32[4,128], index: 0, kind: input, shape index: {}]   ;;  %s347_s1 = inlined_call_operand.vmem [shape: f32[6,1,128], index: 1, kind: input, shape index: {}]   ;;  %s348_s2 = inlined_call_operand.vmem [shape: f32[6,11,128], index: 2, kind: input, shape index: {}]   ;;  %s349_s3 = inlined_call_operand.hbm [shape: f32[6,16,128], index: 3, kind: output, shape index: {}]  }
   0x1 LB: > { %s150_s13 = sadd.s32 4294967295, %s254_s12   ;;  %p154_p0 = scmp.lt.s32.totalorder %s254_s12, 1  ;;  %s254_s12 = sphi %s277_s12, %s13_s12  }
   0x2   : > { %p49_p1 = scmp.lt.s32.totalorder (!%p154_p0), %s150_s13, 5  ;;  %s256_s16 = smov (!%p154_p0), [#allocation2]  }
   0x3   : > { %45 = sbr.rel (%p154_p0) target bundleno = 68 (0x44), region = 24  ;;  %s287_s17 = sshll.u32 (!%p154_p0), %s256_s16, 4  ;;  %s80_s17 = int_to_ptr.vmem [resolvable:$true] %s287_s17 }
   0x4   : > { %s174_s5 = scalar_lea.vmem (!%p154_p0), %s347_s1, 6 }
   0x8   : > { %v51_v0 = vld [vmem:[%s346_s0] sm:$0xf]  ;;  %s351_s13 = smov (!%p49_p1, %s150_s13), 5 }
   0x9   : > { %52 = vst [vmem:[#allocation2] sm:$0xf] %v51_v0  ;;  %s53_s20 = scalar_lea.vmem %s347_s1, %s351_s13  ;;  %s155_s21 = sshll.u32 %s351_s13, 4 }
   0xa   : > { %s302_s24 = scalar_lea.hbm %s349_s3, %s155_s21  ;;  %s63_s25 = sshll.u32 %s53_s20, 4  ;;  %s64_s25 = int_to_ptr.vmem [resolvable:$true] %s63_s25 }
   0xb   : > { %s65_s26 = sshll.u32 %s302_s24, 4  ;;  %s139_s27 = scalar_lea.hbm %s302_s24, 1  ;;  %s66_s26 = int_to_ptr.hbm [resolvable:$true] %s65_s26 }
   0xc   : > { %s170_s28 = sshra.s32 %s64_s25, 4  ;;  %s171_s28 = int_to_ptr.vmem [resolvable:$true] %s170_s28 }
   0xd   : > { %s172_s29 = scalar_lea.vmem %s171_s28, 1  ;;  %p175_p3 = scmp.lt.s32.totalorder %s171_s28, %s347_s1 }
   0xe   : > { %p173_p2 = scmp.ne.s32.totalorder %s171_s28, %s172_s29  ;;  %p176_p4 = scmp.lt.s32.totalorder %s174_s5, %s172_s29 }
  0x10   : > { %p177_p5 = por %p176_p4, %p175_p3 }
  0x12   : > { %p178_p6 = pnand %p177_p5, %p173_p2 }
  0x14   : > { %181 = shalt.err (!%p178_p6)  }
  0x15   : > { %s182_s8 = sshra.s32 %s66_s26, 4  ;;  %s315_s14 = scalar_lea.hbm %s349_s3, 96  ;;  %s183_s8 = int_to_ptr.hbm [resolvable:$true] %s182_s8 }
  0x16   : > { %s184_s9 = scalar_lea.hbm %s183_s8, 1  ;;  %p187_p8 = scmp.lt.s32.totalorder %s183_s8, %s349_s3 }
  0x17   : > { %p185_p7 = scmp.ne.s32.totalorder %s183_s8, %s184_s9  ;;  %p188_p9 = scmp.lt.s32.totalorder %s315_s14, %s184_s9 }
  0x19   : > { %p189_p10 = por %p188_p9, %p187_p8 }
  0x1b   : > { %p190_p11 = pnand %p189_p10, %p185_p7 }
  0x1d   : > { %193 = shalt.err (!%p190_p11)  }
  0x1e   : > { %68 = dma.vmem_to_hbm [thread:$0]  %s64_s25, 16, %s66_s26, [#allocation3] }
  0x1f   : > { %s81_s18 = sshll.u32 %s139_s27, 4  ;;  %s85_s22 = scalar_lea.vmem %s348_s2, %s155_s21  ;;  %s82_s18 = int_to_ptr.hbm [resolvable:$true] %s81_s18 }
  0x20   : > { %s144_s23 = scalar_lea.hbm %s302_s24, 5  ;;  %s206_s28 = sshra.s32 %s82_s18, 4  ;;  %s207_s28 = int_to_ptr.hbm [resolvable:$true] %s206_s28 }
  0x21   : > { %s208_s29 = scalar_lea.hbm %s207_s28, 4  ;;  %p211_p13 = scmp.lt.s32.totalorder %s207_s28, %s349_s3 }
  0x22   : > { %p209_p12 = scmp.ne.s32.totalorder %s207_s28, %s208_s29  ;;  %p212_p0 = scmp.lt.s32.totalorder %s315_s14, %s208_s29 }
  0x24   : > { %p213_p1 = por %p212_p0, %p211_p13 }
  0x26   : > { %p214_p2 = pnand %p213_p1, %p209_p12 }
  0x28   : > { %217 = shalt.err (!%p214_p2)  }
  0x29   : > { %84 = dma.vmem_to_hbm [thread:$0]  %s80_s17, 64, %s82_s18, [#allocation3 + $0x1] }
  0x2a   : > { %s96_s13 = sshll.u32 %s85_s22, 4  ;;  %s98_s25 = sshll.u32 %s144_s23, 4  ;;  %s97_s13 = int_to_ptr.vmem [resolvable:$true] %s96_s13  ;;  %s99_s25 = int_to_ptr.hbm [resolvable:$true] %s98_s25 }
  0x2b   : > { %s218_s21 = sshra.s32 %s97_s13, 4  ;;  %s222_s5 = scalar_lea.vmem %s348_s2, 96  ;;  %s219_s21 = int_to_ptr.vmem [resolvable:$true] %s218_s21 }
  0x2c   : > { %s220_s24 = scalar_lea.vmem %s219_s21, 11  ;;  %p223_p4 = scmp.lt.s32.totalorder %s219_s21, %s348_s2 }
  0x2d   : > { %p221_p3 = scmp.ne.s32.totalorder %s219_s21, %s220_s24  ;;  %p224_p5 = scmp.lt.s32.totalorder %s222_s5, %s220_s24 }
  0x2f   : > { %p225_p6 = por %p224_p5, %p223_p4 }
  0x31   : > { %p226_p7 = pnand %p225_p6, %p221_p3 }
  0x33   : > { %229 = shalt.err (!%p226_p7)  }
  0x34   : > { %s230_s17 = sshra.s32 %s99_s25, 4  ;;  %s231_s17 = int_to_ptr.hbm [resolvable:$true] %s230_s17 }
  0x35   : > { %s232_s8 = scalar_lea.hbm %s231_s17, 11  ;;  %p235_p9 = scmp.lt.s32.totalorder %s231_s17, %s349_s3 }
  0x36   : > { %p233_p8 = scmp.ne.s32.totalorder %s231_s17, %s232_s8  ;;  %p236_p10 = scmp.lt.s32.totalorder %s315_s14, %s232_s8 }
  0x38   : > { %p237_p11 = por %p236_p10, %p235_p9 }
  0x3a   : > { %p238_p12 = pnand %p237_p11, %p233_p8 }
  0x3c   : > { %241 = shalt.err (!%p238_p12)  }
  0x3d   : > { %101 = dma.vmem_to_hbm [thread:$0]  %s97_s13, 176, %s99_s25, [#allocation3 + $0x2] }
  0x3e   : > { %246 = dma.done.wait [#allocation3], 16 }
  0x3f   : > { %247 = vsyncadd [#allocation3], 4294967280 }
  0x40   : > { %248 = dma.done.wait [#allocation3 + $0x1], 64 }
  0x41   : > { %249 = vsyncadd [#allocation3 + $0x1], 4294967232 }
  0x42   : > { %250 = dma.done.wait [#allocation3 + $0x2], 176 }
  0x43   : > { %251 = vsyncadd [#allocation3 + $0x2], 4294967120 }
  0x44 PF: > { %s13_s12 = sadd.s32 1, %s254_s12  }
  0x45   : > { %p10_p13 = scmp.ge.s32.totalorder %s13_s12, 7  }
  0x47   :  { %12 = sbr.rel (!%p10_p13) target bundleno = 1 (0x1), region = 56 }
  0x4c   :  { %114 = vsyncmov [#allocation3] }
  0x4f   :  { %s115_s11 = vpop.sfrf %114 }
  0x50   :  { %p158_p0 = scmp.ne.s32.totalorder %s115_s11, 0 }
  0x52   :  { %119 = shalt.err (%p158_p0)  }
  0x53   :  { %121 = vsyncmov [#allocation3 + $0x1] }
  0x56   :  { %s122_s14 = vpop.sfrf %121 }
  0x57   :  { %p159_p1 = scmp.ne.s32.totalorder %s122_s14, 0 }
  0x59   :  { %126 = shalt.err (%p159_p1)  }
  0x5a   :  { %128 = vsyncmov [#allocation3 + $0x2] }
  0x5d   :  { %s129_s15 = vpop.sfrf %128 }
  0x5e   :  { %p160_p2 = scmp.ne.s32.totalorder %s129_s15, 0 }
  0x60   :  { %133 = shalt.err (%p160_p2)  }

</bundles_post_ra>
